<compile_context>
chip_gen: v7x
topology: tpu7x:2x2x1
jax: 0.10.0
libtpu: 0.0.40
codegen_flags: <defaults>
</compile_context>

<pallas_src>
import functools

import jax
import jax.numpy as jnp
from jax.experimental import pallas as pl
from jax.experimental.pallas import tpu as pltpu


def _round_up(a: int, b: int) -> int:
    return (a + b - 1) // b * b


# ----------------------------------------------------------------------------
# Kernels
# ----------------------------------------------------------------------------

def _slice_copy_kernel(x_ref, o_ref, *, off: int, k: int):
    # x_ref: (tm, bw) VMEM tile of the 128-aligned column window
    # o_ref: (tm, k)  VMEM tile of the output
    # einsum('ij,kj->ik', x, one_hot_W) == x[:, i:i+k]  -> plain copy of the
    # (< 128 column) residual offset inside the already-narrow window.
    o_ref[...] = x_ref[:, off:off + k]


def _dma_slice_kernel(x_hbm, o_hbm, sem, *, col: int, k: int):
    # One strided HBM->HBM DMA: rows are M, each row copies k contiguous
    # elements starting at column `col`.  Destination is fully contiguous.
    cp = pltpu.make_async_copy(x_hbm.at[:, pl.ds(col, k)], o_hbm, sem)
    cp.start()
    cp.wait()


# ----------------------------------------------------------------------------
# Tiling helpers (static Python, trace time only)
# ----------------------------------------------------------------------------

def _column_window(d: int, i: int, k: int):
    """Smallest 128-aligned column block [c0, c0+bw) covering [i, i+k) such
    that c0 % bw == 0 (so the BlockSpec column index c0 // bw is an integer).
    Returns (c0, bw, off) with off = i - c0."""
    if d <= 128:
        return 0, d, i                      # whole row; block == full dim is legal
    bw = _round_up(max(k, 1), 128)
    while True:
        c0 = (i // bw) * bw
        if i + k <= c0 + bw:
            break
        bw += 128                           # terminates at bw = round_up(i+k, 128)
    if bw >= d:
        return 0, d, i                      # window degenerated to the full row
    return c0, bw, i - c0


def _choose_tm(m: int, bw: int, k: int, itemsize: int) -> int:
    """Row-tile size from a conservative VMEM budget (fits every generation)."""
    bw_pad = _round_up(bw, 128)
    k_pad = _round_up(k, 128)
    budget = 24 * 1024 * 1024               # double-buffered working set target
    per_row = 2 * (bw_pad + k_pad) * max(itemsize, 1)
    tm = max(8, min(2048, budget // per_row))
    tm -= tm % 8                            # sublane multiple (f32)
    if tm >= 32:
        tm -= tm % 32                       # also packing-friendly for bf16/int8
    tm = min(tm, _round_up(m, 8))
    # Keep >= 2 grid steps when there is enough work: enables double-buffering
    # and lets the "parallel" axis shard across both v7x TensorCores.
    if m > 1024 and pl.cdiv(m, tm) < 2:
        tm = _round_up(pl.cdiv(m, 2), 32)
    return max(tm, 8)


# ----------------------------------------------------------------------------
# Wrappers
# ----------------------------------------------------------------------------

def _part_dma(x_flat: jnp.ndarray, i: int, k: int) -> jnp.ndarray:
    m, _ = x_flat.shape
    return pl.pallas_call(
        functools.partial(_dma_slice_kernel, col=i, k=k),
        out_shape=jax.ShapeDtypeStruct((m, k), x_flat.dtype),
        in_specs=[pl.BlockSpec(memory_space=pl.ANY)],
        out_specs=pl.BlockSpec(memory_space=pl.ANY),
        scratch_shapes=[pltpu.SemaphoreType.DMA],
    )(x_flat)


def _part_tiled(x_flat: jnp.ndarray, i: int, k: int) -> jnp.ndarray:
    m, d = x_flat.shape
    itemsize = jnp.dtype(x_flat.dtype).itemsize
    c0, bw, off = _column_window(d, i, k)
    cb = c0 // bw                            # integer column-block index
    tm = _choose_tm(m, bw, k, itemsize)
    grid = (pl.cdiv(m, tm),)

    return pl.pallas_call(
        functools.partial(_slice_copy_kernel, off=off, k=k),
        out_shape=jax.ShapeDtypeStruct((m, k), x_flat.dtype),
        grid_spec=pltpu.PrefetchScalarGridSpec(
            num_scalar_prefetch=0,
            grid=grid,
            in_specs=[pl.BlockSpec((tm, bw), lambda r: (r, cb))],
            out_specs=pl.BlockSpec((tm, k), lambda r: (r, 0)),
        ),
        compiler_params=pltpu.CompilerParams(
            dimension_semantics=("parallel",),
            # 48 MiB: > v5e's 16 MiB scoped default, < v7x's 64 MiB physical.
            vmem_limit_bytes=48 * 1024 * 1024,
        ),
    )(x_flat)


def part_layer(x: jnp.ndarray, i: int, j: int) -> jnp.ndarray:
    """x: (B, S, D) -> (B, S, j-i); equivalent to einsum('bij,kj->bik', x, W)."""
    b, s, d = x.shape
    k = j - i
    assert 0 <= i and k > 0 and i + k <= d
    m = b * s
    x_flat = x.reshape(m, d)                 # contiguous reshape, free
    itemsize = jnp.dtype(x.dtype).itemsize

    if k * itemsize >= 512:
        # Wide slice: single strided DMA is at the HBM roofline.
        out_flat = _part_dma(x_flat, i, k)
    else:
        # Very narrow slice: strided-DMA descriptor overhead bites; use the
        # tiled copy with a minimal 128-aligned input window instead.
        out_flat = _part_tiled(x_flat, i, k)
    return out_flat.reshape(b, s, k)


def make_part_weight(dim: int, i: int, j: int) -> jnp.ndarray:
    """Deterministic init matching Part_Layer.__init__ (reference check only;
    the kernels never read W)."""
    k = j - i
    rows = jnp.arange(k)
    w = jnp.zeros((k, dim), dtype=jnp.float32)
    w = w.at[rows, i + rows].set(1.0)
    return w


if __name__ == "__main__":
    key = jax.random.PRNGKey(0)

    # --- Config 1: narrow slice -> tiled-copy path (module-consistent shapes)
    B, S, D = 2, 8, 32
    i0, j0 = 4, 20                            # K = 16
    x = jax.random.normal(key, (B, S, D), dtype=jnp.float32)
    out = jax.block_until_ready(part_layer(x, i0, j0))
    w = make_part_weight(D, i0, j0)
    ref = jnp.einsum('bij,kj->bik', x, w)
    assert out.shape == (B, S, j0 - i0), out.shape
    assert jnp.allclose(out, ref, atol=1e-6), "tiled path mismatch vs reference"

    # --- Config 2: wide slice -> single strided HBM->HBM DMA path
    B2, S2, D2 = 2, 8, 512
    i1, j1 = 128, 384                         # K = 256
    x2 = jax.random.normal(jax.random.PRNGKey(0), (B2, S2, D2), dtype=jnp.float32)
    out2 = jax.block_until_ready(part_layer(x2, i1, j1))
    ref2 = x2[:, :, i1:j1]
    assert out2.shape == (B2, S2, j1 - i1), out2.shape
    assert jnp.allclose(out2, ref2, atol=1e-6), "DMA path mismatch vs reference"

    print("KERNEL_OK")
</pallas_src>

<mosaic_0001>
module attributes {stable_mosaic.version = 11 : i64} {
  func.func @_slice_copy_kernel(%arg0: i32, %arg1: memref<16x32xf32, #tpu.memory_space<vmem>>, %arg2: memref<16x16xf32, #tpu.memory_space<vmem>>) attributes {dimension_semantics = [#tpu.dimension_semantics<parallel>], iteration_bounds = array<i64: 1>, scalar_prefetch = 0 : i64, scratch_operands = 0 : i64, tpu.core_type = #tpu.core_type<tc>, window_params = [{transform_indices = @transform_0, window_bounds = array<i64: 16, 32>}, {transform_indices = @transform_1, window_bounds = array<i64: 16, 16>}]} {
    %c0 = arith.constant 0 : index
    %c4 = arith.constant 4 : index
    %0 = vector.load %arg1[%c0, %c4] : memref<16x32xf32, #tpu.memory_space<vmem>>, vector<16x16xf32>
    %c0_0 = arith.constant 0 : index
    %c0_1 = arith.constant 0 : index
    %1 = vector.load %arg2[%c0_0, %c0_1] : memref<16x16xf32, #tpu.memory_space<vmem>>, vector<16x16xf32>
    tpu.vector_store %arg2[%c0_0, %c0_1], %0 {strides = array<i32>} : memref<16x16xf32, #tpu.memory_space<vmem>>, vector<16x16xf32>,
    return
  }
  func.func @transform_0(%arg0: i32) -> (i32, i32) {
    %c0_i32 = arith.constant 0 : i32
    %c0_i32_0 = arith.constant 0 : i32
    return %arg0, %c0_i32 : i32, i32
  }
  func.func @transform_1(%arg0: i32) -> (i32, i32) {
    %c0_i32 = arith.constant 0 : i32
    %c0_i32_0 = arith.constant 0 : i32
    return %arg0, %c0_i32 : i32, i32
  }
}

</mosaic_0001>

<bundles_post_ra>
// kernel: tpu_custom_call.1
= control target key start
LH: loop header
LB: loop body
LE: loop exit
PB: predicated region body
PF: predicated region fallthrough
CT: control target
= control target key end

     0   :  { %6 = vsyncpa [#allocation3], 0  ;;  %s151_s0 = inlined_call_operand.hbm [shape: f32[16,32], index: 0, kind: input, shape index: {}]   ;;  %s152_s1 = inlined_call_operand.hbm [shape: f32[16,16], index: 1, kind: output, shape index: {}]  }
   0x1   :  { %7 = vsyncpa [#allocation4], 0  ;;  %s106_s6 = smov [#allocation2]   ;;  %s58_s10 = scalar_lea.hbm %s151_s0, 256 }
   0x2   :  { %s13_s7 = sshll.u32 %s106_s6, 4  ;;  %p59_p0 = scmp.ne.s32.totalorder %s151_s0, %s58_s10  ;;  %s14_s7 = int_to_ptr.vmem [resolvable:$true] %s13_s7 }
   0x3   :  { %p62_p1 = scmp.lt.u32.totalorder %s58_s10, %s151_s0 }
   0x5   :  { %p64_p2 = pnand %p62_p1, %p59_p0 }
   0x7   :  { %67 = shalt.err (!%p64_p2)
}
   0x8   :  { %s68_s15 = scalar_lea.vmem %s14_s7, 256  ;;  %p73_p4 = scmp.lt.s32.totalorder %s14_s7, %s14_s7 }
   0x9   :  { %p69_p3 = scmp.ne.s32.totalorder %s14_s7, %s68_s15  ;;  %p74_p5 = scmp.lt.s32.totalorder %s68_s15, %s68_s15 }
   0xb   :  { %p75_p6 = por %p74_p5, %p73_p4 }
   0xd   :  { %p76_p7 = pnand %p75_p6, %p69_p3 }
   0xf   :  { %79 = shalt.err (!%p76_p7)
}
  0x10   :  { %s107_s16 = smov 128   ;;  %s108_s17 = smov 8  }
  0x11   :  { %19 = dma.hbm_to_vmem [thread:$0]  %s151_s0, 256, %s14_s7, [#allocation3], %s107_s16, %s107_s16, %s108_s17  }
  0x12   :  { %102 = dma.done.wait [#allocation3], 256  }
  0x13   :  { %103 = vsyncadd [#allocation3], 4294967040  ;;  %v23_v0 = vld [vmem:[#allocation2] sm:$0xff]  ;;  %s109_s20 = smov 124   ;;  %v24_v1 = vld [vmem:[#allocation2 + $0x8] sm:$0xff]  ;;  %vm33_vm0 = vcmask 130048  }
  0x14   :  { %27 = vrot.lane.b32.xlu0 %v23_v0, %s109_s20  ;;  %s110_s21 = smov [#allocation5]  }
  0x15   :  { %s41_s22 = sshll.u32 %s110_s21, 4  ;;  %s42_s22 = int_to_ptr.vmem [resolvable:$true] %s41_s22 }
  0x16   :  { %s80_s23 = scalar_lea.vmem %s42_s22, 256  ;;  %p85_p9 = scmp.lt.s32.totalorder %s42_s22, %s42_s22 }
  0x17   :  { %p81_p8 = scmp.ne.s32.totalorder %s42_s22, %s80_s23  ;;  %p86_p10 = scmp.lt.s32.totalorder %s80_s23, %s80_s23 }
  0x18   :  { %29 = vrot.lane.b32.xlu0 %v24_v1, %s109_s20 }
  0x19   :  { %p87_p11 = por %p86_p10, %p85_p9 }
  0x1b   :  { %p88_p12 = pnand %p87_p11, %p81_p8 }
  0x86   :  { %v28_v2 = vpop.permute.xlu0 %27 }
  0x87   :  { %34 = vst.msk [vmem:[#allocation5] sm:$0xff] %vm33_vm0, %v28_v2 }
  0x8a   :  { %v30_v3 = vpop.permute.xlu0 %29 }
  0x8b   :  { %35 = vst.msk [vmem:[#allocation5 + $0x8] sm:$0xff] %vm33_vm0, %v30_v3 }
  0x8c   :  { %91 = shalt.err (!%p88_p12)
}
  0x8d   :  { %s92_s25 = scalar_lea.hbm %s152_s1, 256 }
  0x8e   :  { %p93_p13 = scmp.ne.s32.totalorder %s152_s1, %s92_s25  ;;  %p96_p0 = scmp.lt.u32.totalorder %s92_s25, %s152_s1 }
  0x90   :  { %p98_p1 = pnand %p96_p0, %p93_p13 }
  0x92   :  { %101 = shalt.err (!%p98_p1)
}
  0x93   :  { %47 = dma.vmem_to_hbm [thread:$0]  %s42_s22, 256, %s152_s1, [#allocation4], %s107_s16, %s107_s16, %s108_s17  }
  0x94   :  { %104 = dma.done.wait [#allocation4], 256  }
  0x95   :  { %105 = vsyncadd [#allocation4], 4294967040 }
  0x96   :  { %51 = vsyncpa [#allocation3], 1 }
  0x97   :  { %52 = vsyncpa [#allocation4], 1 }

</bundles_post_ra>
